<compile_context>
chip_gen: v7x
topology: tpu7x:2x2x1
jax: 0.10.0
libtpu: 0.0.40
codegen_flags: <defaults>
</compile_context>

<pallas_src>
import functools

import jax
import jax.numpy as jnp
from jax.experimental import pallas as pl
from jax.experimental.pallas import tpu as pltpu


def _round_up(x, m):
    return (x + m - 1) // m * m


# ---------------------------------------------------------------------------
# Kernel 1: fused projection
#   y = x @ [W_neigh | W_self]  ->  t = y[:, :Fo]           (stream dtype)
#                                   s = y[:, Fo:] + bias    (f32)
# ---------------------------------------------------------------------------
def _project_kernel(x_ref, w_ref, b_ref, t_ref, s_ref):
    y = jnp.dot(x_ref[...], w_ref[...], preferred_element_type=jnp.float32)
    fo_p = t_ref.shape[-1]
    t_ref[...] = y[:, :fo_p].astype(t_ref.dtype)
    s_ref[...] = y[:, fo_p:] + b_ref[...]


def _project(h, w_fused, b_p, fo_p, *, tm_proj, t_dtype):
    n_rows, fi_p = h.shape
    return pl.pallas_call(
        _project_kernel,
        out_shape=(
            jax.ShapeDtypeStruct((n_rows, fo_p), t_dtype),     # t = x @ W_neigh
            jax.ShapeDtypeStruct((n_rows, fo_p), jnp.float32),  # s = x @ W_self + b
        ),
        grid=(n_rows // tm_proj,),
        in_specs=[
            pl.BlockSpec((tm_proj, fi_p), lambda i: (i, 0)),
            pl.BlockSpec((fi_p, 2 * fo_p), lambda i: (0, 0)),
            pl.BlockSpec((1, fo_p), lambda i: (0, 0)),
        ],
        out_specs=[
            pl.BlockSpec((tm_proj, fo_p), lambda i: (i, 0)),
            pl.BlockSpec((tm_proj, fo_p), lambda i: (i, 0)),
        ],
        compiler_params=pltpu.CompilerParams(
            dimension_semantics=("parallel",)
        ),
    )(h, w_fused, b_p)


# ---------------------------------------------------------------------------
# Kernel 2: aggregation
#   out = (A_bin @ t) * dinv + s
# grid = (row tiles, K tiles); A streamed as int8 binary, upcast in-kernel;
# f32 VMEM accumulator; row normalization + self path applied at last K step.
# ---------------------------------------------------------------------------
def _aggregate_kernel(a_ref, t_ref, s_ref, dinv_ref, o_ref, acc_ref):
    k = pl.program_id(1)

    @pl.when(k == 0)
    def _init():
        acc_ref[...] = jnp.zeros_like(acc_ref)

    t = t_ref[...]
    a = a_ref[...].astype(t.dtype)  # binary 0/1: exact in bf16/f32
    acc_ref[...] += jnp.dot(a, t, preferred_element_type=jnp.float32)

    @pl.when(k == pl.num_programs(1) - 1)
    def _finalize():
        o_ref[...] = acc_ref[...] * dinv_ref[...] + s_ref[...]


def _aggregate(a_pad, t, s, dinv_pad, fo_p, *, tm, tk):
    n_rows_pad, n_cols_pad = a_pad.shape
    return pl.pallas_call(
        _aggregate_kernel,
        out_shape=jax.ShapeDtypeStruct((n_rows_pad, fo_p), jnp.float32),
        grid=(n_rows_pad // tm, n_cols_pad // tk),
        in_specs=[
            pl.BlockSpec((tm, tk), lambda i, k: (i, k)),        # binary A tile
            pl.BlockSpec((tk, fo_p), lambda i, k: (k, 0)),      # t = x @ W_neigh
            pl.BlockSpec((tm, fo_p), lambda i, k: (i, 0)),      # s = x @ W_self + b
            pl.BlockSpec((tm, 1), lambda i, k: (i, 0)),         # 1/deg (f32)
        ],
        out_specs=pl.BlockSpec((tm, fo_p), lambda i, k: (i, 0)),
        scratch_shapes=[pltpu.VMEM((tm, fo_p), jnp.float32)],
        compiler_params=pltpu.CompilerParams(
            dimension_semantics=("parallel", "arbitrary"),
            vmem_limit_bytes=32 * 1024 * 1024,
        ),
    )(a_pad, t, s, dinv_pad)


# ---------------------------------------------------------------------------
# Full forward pass (padding / tiling choices)
# ---------------------------------------------------------------------------
@functools.partial(jax.jit, static_argnames=("tm", "tk", "a_dtype", "stream_dtype"))
def graphsage_forward(adj, x, params, *, tm=256, tk=None,
                      a_dtype=jnp.int8, stream_dtype=jnp.bfloat16):
    """GraphSAGE forward: chain of SAGEConv(mean) layers.

    adj    : (N, N) binary {0,1} adjacency (row i -> in-neighbors of node i).
    x      : (N, F_in) f32 node features.
    params : tuple of (w_self (Fi,Fo), w_neigh (Fi,Fo), bias (1,Fo)) per layer.
    a_dtype      : HBM storage dtype for the binary adjacency (int8 default ->
                   4x fewer bytes than f32 on the dominant read; exact).
    stream_dtype : dtype for the projected neighbor features t = x @ W_neigh.
                   Accumulation and normalization stay f32.
    """
    n, f_in = x.shape
    n128 = _round_up(n, 128)

    # ---- tile selection (all multiples of 128) ----------------------------
    tm_t = max(128, min(_round_up(tm, 128), n128))
    half = (n128 // 2) // 128 * 128
    if half >= 128:
        tm_t = min(tm_t, half)          # >= 2 row tiles when possible (v7x megacore)

    fo_max_p = max(_round_up(ws.shape[1], 128) for (ws, _, _) in params)
    a_bytes = jnp.dtype(a_dtype).itemsize
    t_bytes = jnp.dtype(stream_dtype).itemsize
    # Double-buffered A + t per K-column; keep plan under a ~22 MiB budget
    # (vmem_limit_bytes set to 32 MiB above -> safe on v5e/v6e/v7x).
    budget = 22 * 1024 * 1024
    per_col = 2 * (tm_t * a_bytes + fo_max_p * t_bytes)
    tk_budget = max(128, (budget // per_col) // 128 * 128)
    tk_req = n128 if tk is None else max(128, _round_up(tk, 128))
    tk_t = max(128, min(tk_req, n128, tk_budget))

    n_rows_pad = _round_up(n, tm_t)      # rows / output padded to tm
    n_cols_pad = _round_up(n, tk_t)      # columns / t padded to tk (independent!)
    max_pad = max(n_rows_pad, n_cols_pad)

    # projection row tile: largest of {1024,512,256,128} dividing max_pad
    tm_proj = 128
    for cand in (1024, 512, 256):
        if max_pad % cand == 0:
            tm_proj = cand
            break

    # ---- operand preparation ----------------------------------------------
    adj_f = adj.astype(jnp.float32)
    deg = jnp.sum(adj_f, axis=1, keepdims=True)
    dinv = 1.0 / jnp.maximum(deg, 1.0)                   # zero in-degree -> row stays 0
    dinv_pad = jnp.pad(dinv, ((0, n_rows_pad - n), (0, 0)))
    a_pad = jnp.pad(adj_f, ((0, n_rows_pad - n), (0, n_cols_pad - n))).astype(a_dtype)

    f_in_p = _round_up(f_in, 128)
    h = jnp.pad(x.astype(jnp.float32), ((0, max_pad - n), (0, f_in_p - f_in)))

    # ---- layer chain --------------------------------------------------------
    for (w_self, w_neigh, bias) in params:
        fi, fo = w_self.shape
        fi_p, fo_p = _round_up(fi, 128), _round_up(fo, 128)
        w_fused = jnp.zeros((fi_p, 2 * fo_p), jnp.float32)
        w_fused = w_fused.at[:fi, :fo].set(w_neigh)                 # neighbor half
        w_fused = w_fused.at[:fi, fo_p:fo_p + fo].set(w_self)       # self half
        b_p = jnp.pad(bias, ((0, 0), (0, fo_p - fo)))

        t, s = _project(h, w_fused, b_p, fo_p, tm_proj=tm_proj, t_dtype=stream_dtype)
        out = _aggregate(a_pad, t, s, dinv_pad, fo_p, tm=tm_t, tk=tk_t)

        # re-pad rows so the next projection covers both row- and col-padded ranges
        h = jnp.pad(out, ((0, max_pad - n_rows_pad), (0, 0)))

    f_out = params[-1][0].shape[1]
    return h[:n, :f_out]


# ---------------------------------------------------------------------------
# Parameter init, graph construction, plain-JAX reference
# ---------------------------------------------------------------------------
def init_graphsage_params(key, in_feats, hidden_feats, out_feats, num_layers):
    if isinstance(hidden_feats, int):
        hidden_feats = [hidden_feats for _ in range(num_layers - 1)]
    dims = [in_feats] + list(hidden_feats) + [out_feats]
    params = []
    for li in range(num_layers):
        f_in, f_out = dims[li], dims[li + 1]
        k1, k2, key = jax.random.split(key, 3)
        scale = 1.0 / jnp.sqrt(jnp.float32(f_in))
        w_self = jax.random.normal(k1, (f_in, f_out), jnp.float32) * scale
        w_neigh = jax.random.normal(k2, (f_in, f_out), jnp.float32) * scale
        bias = jnp.zeros((1, f_out), jnp.float32)
        params.append((w_self, w_neigh, bias))
    return tuple(params)


def build_binary_adjacency(key, n_nodes):
    """Random directed graph -> binary {0,1} dense adjacency (no self loops)."""
    adj = jax.random.bernoulli(key, p=0.2, shape=(n_nodes, n_nodes)).astype(
        jnp.float32
    )
    return adj * (1.0 - jnp.eye(n_nodes, dtype=jnp.float32))


def reference_forward(adj, x, params):
    deg = jnp.sum(adj, axis=1, keepdims=True)
    a_mean = adj / jnp.maximum(deg, 1.0)   # DGL 'mean': zero in-degree -> zeros
    h = x
    for (w_self, w_neigh, bias) in params:
        h = h @ w_self + (a_mean @ h) @ w_neigh + bias
    return h


if __name__ == "__main__":
    key = jax.random.PRNGKey(0)
    k_graph, k_feat, k_param = jax.random.split(key, 3)

    N, IN_FEATS, HIDDEN_FEATS, OUT_FEATS, NUM_LAYERS = 256, 32, 64, 16, 3

    adj = build_binary_adjacency(k_graph, N)
    x = jax.random.normal(k_feat, (N, IN_FEATS), jnp.float32)
    params = init_graphsage_params(
        k_param, IN_FEATS, HIDDEN_FEATS, OUT_FEATS, NUM_LAYERS
    )

    ref = reference_forward(adj, x, params)

    # Exact-ish path: int8 binary adjacency (exact), f32 streamed t, f32 accumulate.
    out = graphsage_forward(adj, x, params, tm=128, tk=128,
                            a_dtype=jnp.int8, stream_dtype=jnp.float32)
    out = jax.block_until_ready(out)
    assert out.shape == (N, OUT_FEATS)
    assert jnp.allclose(out, ref, atol=1e-4, rtol=1e-4)

    # Default fast path: int8 A (4x fewer HBM bytes), bf16 t, auto tile sizing
    # (K axis collapses to one step for this N). Normalization stays f32-exact;
    # only t is rounded to bf16.
    out_fast = graphsage_forward(adj, x, params)
    out_fast = jax.block_until_ready(out_fast)
    assert out_fast.shape == (N, OUT_FEATS)
    assert jnp.allclose(out_fast, ref, atol=5e-2, rtol=5e-2)

    print("KERNEL_OK")
</pallas_src>

<mosaic_0001>
module attributes {stable_mosaic.version = 11 : i64} {
  func.func @_project_kernel(%arg0: i32, %arg1: memref<256x128xf32, #tpu.memory_space<vmem>>, %arg2: memref<128x256xf32, #tpu.memory_space<vmem>>, %arg3: memref<1x128xf32, #tpu.memory_space<vmem>>, %arg4: memref<256x128xf32, #tpu.memory_space<vmem>>, %arg5: memref<256x128xf32, #tpu.memory_space<vmem>>) attributes {dimension_semantics = [#tpu.dimension_semantics<parallel>], iteration_bounds = array<i64: 1>, scalar_prefetch = 0 : i64, scratch_operands = 0 : i64, tpu.core_type = #tpu.core_type<tc>, window_params = [{transform_indices = @transform_0, window_bounds = array<i64: 256, 128>}, {pipeline_mode = #tpu.pipeline_mode<synchronous>, transform_indices = @transform_1, window_bounds = array<i64: 128, 256>}, {pipeline_mode = #tpu.pipeline_mode<synchronous>, transform_indices = @transform_2, window_bounds = array<i64: 1, 128>}, {transform_indices = @transform_3, window_bounds = array<i64: 256, 128>}, {transform_indices = @transform_4, window_bounds = array<i64: 256, 128>}]} {
    %c0 = arith.constant 0 : index
    %c0_0 = arith.constant 0 : index
    %0 = vector.load %arg1[%c0, %c0_0] : memref<256x128xf32, #tpu.memory_space<vmem>>, vector<256x128xf32>
    %c0_1 = arith.constant 0 : index
    %c0_2 = arith.constant 0 : index
    %1 = vector.load %arg2[%c0_1, %c0_2] : memref<128x256xf32, #tpu.memory_space<vmem>>, vector<128x256xf32>
    %cst = arith.constant dense<0.000000e+00> : vector<256x256xf32>
    %2 = tpu.matmul %0, %1, %cst {dimension_numbers = #tpu.dot_dimension_numbers<[1], [0], [0], [1], [0, 0, 1, 1], [], []>} : vector<256x128xf32>, vector<128x256xf32>, vector<256x256xf32> -> vector<256x256xf32>
    %3 = vector.extract_strided_slice %2 {offsets = [0, 0], sizes = [256, 128], strides = [1, 1]} : vector<256x256xf32> to vector<256x128xf32>
    %c0_3 = arith.constant 0 : index
    %c0_4 = arith.constant 0 : index
    %4 = vector.load %arg4[%c0_3, %c0_4] : memref<256x128xf32, #tpu.memory_space<vmem>>, vector<256x128xf32>
    tpu.vector_store %arg4[%c0_3, %c0_4], %3 {strides = array<i32>} : memref<256x128xf32, #tpu.memory_space<vmem>>, vector<256x128xf32>,
    %5 = vector.extract_strided_slice %2 {offsets = [0, 128], sizes = [256, 128], strides = [1, 1]} : vector<256x256xf32> to vector<256x128xf32>
    %c0_5 = arith.constant 0 : index
    %c0_6 = arith.constant 0 : index
    %6 = vector.load %arg3[%c0_5, %c0_6] : memref<1x128xf32, #tpu.memory_space<vmem>>, vector<1x128xf32>
    %7 = vector.broadcast %6 : vector<1x128xf32> to vector<256x128xf32>
    %8 = arith.addf %5, %7 : vector<256x128xf32>
    %c0_7 = arith.constant 0 : index
    %c0_8 = arith.constant 0 : index
    %9 = vector.load %arg5[%c0_7, %c0_8] : memref<256x128xf32, #tpu.memory_space<vmem>>, vector<256x128xf32>
    tpu.vector_store %arg5[%c0_7, %c0_8], %8 {strides = array<i32>} : memref<256x128xf32, #tpu.memory_space<vmem>>, vector<256x128xf32>,
    return
  }
  func.func @transform_0(%arg0: i32) -> (i32, i32) {
    %c0_i32 = arith.constant 0 : i32
    %c0_i32_0 = arith.constant 0 : i32
    return %arg0, %c0_i32 : i32, i32
  }
  func.func @transform_1(%arg0: i32) -> (i32, i32) {
    %c0_i32 = arith.constant 0 : i32
    %c0_i32_0 = arith.constant 0 : i32
    %c0_i32_1 = arith.constant 0 : i32
    return %c0_i32, %c0_i32_0 : i32, i32
  }
  func.func @transform_2(%arg0: i32) -> (i32, i32) {
    %c0_i32 = arith.constant 0 : i32
    %c0_i32_0 = arith.constant 0 : i32
    %c0_i32_1 = arith.constant 0 : i32
    return %c0_i32, %c0_i32_0 : i32, i32
  }
  func.func @transform_3(%arg0: i32) -> (i32, i32) {
    %c0_i32 = arith.constant 0 : i32
    %c0_i32_0 = arith.constant 0 : i32
    return %arg0, %c0_i32 : i32, i32
  }
  func.func @transform_4(%arg0: i32) -> (i32, i32) {
    %c0_i32 = arith.constant 0 : i32
    %c0_i32_0 = arith.constant 0 : i32
    return %arg0, %c0_i32 : i32, i32
  }
}

module attributes {stable_mosaic.version = 11 : i64} {
  func.func @_aggregate_kernel(%arg0: i32, %arg1: i32, %arg2: memref<128x128xi8, #tpu.memory_space<vmem>>, %arg3: memref<128x128xf32, #tpu.memory_space<vmem>>, %arg4: memref<128x128xf32, #tpu.memory_space<vmem>>, %arg5: memref<128x1xf32, #tpu.memory_space<vmem>>, %arg6: memref<128x128xf32, #tpu.memory_space<vmem>>, %arg7: memref<128x128xf32, #tpu.memory_space<vmem>>) attributes {dimension_semantics = [#tpu.dimension_semantics<parallel>, #tpu.dimension_semantics<arbitrary>], iteration_bounds = array<i64: 2, 2>, scalar_prefetch = 0 : i64, scratch_operands = 1 : i64, tpu.core_type = #tpu.core_type<tc>, window_params = [{transform_indices = @transform_0, window_bounds = array<i64: 128, 128>}, {transform_indices = @transform_1, window_bounds = array<i64: 128, 128>}, {transform_indices = @transform_2, window_bounds = array<i64: 128, 128>}, {transform_indices = @transform_3, window_bounds = array<i64: 128, 1>}, {transform_indices = @transform_4, window_bounds = array<i64: 128, 128>}]} {
    %c0_i32 = arith.constant 0 : i32
    %0 = arith.cmpi eq, %arg1, %c0_i32 : i32
    %1 = arith.extui %0 : i1 to i32
    %c0_i32_0 = arith.constant 0 : i32
    %2 = arith.cmpi ne, %1, %c0_i32_0 : i32
    scf.if %2 {
      %cst_9 = arith.constant 0.000000e+00 : f32
      %13 = vector.broadcast %cst_9 : f32 to vector<128x128xf32>
      %c0_10 = arith.constant 0 : index
      %c0_11 = arith.constant 0 : index
      %14 = vector.load %arg7[%c0_10, %c0_11] : memref<128x128xf32, #tpu.memory_space<vmem>>, vector<128x128xf32>
      tpu.vector_store %arg7[%c0_10, %c0_11], %13 {strides = array<i32>} : memref<128x128xf32, #tpu.memory_space<vmem>>, vector<128x128xf32>,
    } else {
    }
    %c0 = arith.constant 0 : index
    %c0_1 = arith.constant 0 : index
    %3 = vector.load %arg3[%c0, %c0_1] : memref<128x128xf32, #tpu.memory_space<vmem>>, vector<128x128xf32>
    %c0_2 = arith.constant 0 : index
    %c0_3 = arith.constant 0 : index
    %4 = vector.load %arg2[%c0_2, %c0_3] : memref<128x128xi8, #tpu.memory_space<vmem>>, vector<128x128xi8>
    %5 = arith.sitofp %4 : vector<128x128xi8> to vector<128x128xf32>
    %c0_4 = arith.constant 0 : index
    %c0_5 = arith.constant 0 : index
    %6 = vector.load %arg7[%c0_4, %c0_5] : memref<128x128xf32, #tpu.memory_space<vmem>>, vector<128x128xf32>
    %cst = arith.constant dense<0.000000e+00> : vector<128x128xf32>
    %7 = tpu.matmul %5, %3, %cst {dimension_numbers = #tpu.dot_dimension_numbers<[1], [0], [0], [1], [0, 0, 1, 1], [], []>} : vector<128x128xf32>, vector<128x128xf32>, vector<128x128xf32> -> vector<128x128xf32>
    %8 = arith.addf %6, %7 : vector<128x128xf32>
    %c0_6 = arith.constant 0 : index
    %c0_7 = arith.constant 0 : index
    %9 = vector.load %arg7[%c0_6, %c0_7] : memref<128x128xf32, #tpu.memory_space<vmem>>, vector<128x128xf32>
    tpu.vector_store %arg7[%c0_6, %c0_7], %8 {strides = array<i32>} : memref<128x128xf32, #tpu.memory_space<vmem>>, vector<128x128xf32>,
    %c1_i32 = arith.constant 1 : i32
    %10 = arith.cmpi eq, %arg1, %c1_i32 : i32
    %11 = arith.extui %10 : i1 to i32
    %c0_i32_8 = arith.constant 0 : i32
    %12 = arith.cmpi ne, %11, %c0_i32_8 : i32
    scf.if %12 {
      %c0_9 = arith.constant 0 : index
      %c0_10 = arith.constant 0 : index
      %13 = vector.load %arg7[%c0_9, %c0_10] : memref<128x128xf32, #tpu.memory_space<vmem>>, vector<128x128xf32>
      %c0_11 = arith.constant 0 : index
      %c0_12 = arith.constant 0 : index
      %14 = vector.load %arg5[%c0_11, %c0_12] : memref<128x1xf32, #tpu.memory_space<vmem>>, vector<128x1xf32>
      %15 = vector.broadcast %14 : vector<128x1xf32> to vector<128x128xf32>
      %16 = arith.mulf %13, %15 : vector<128x128xf32>
      %c0_13 = arith.constant 0 : index
      %c0_14 = arith.constant 0 : index
      %17 = vector.load %arg4[%c0_13, %c0_14] : memref<128x128xf32, #tpu.memory_space<vmem>>, vector<128x128xf32>
      %18 = arith.addf %16, %17 : vector<128x128xf32>
      %c0_15 = arith.constant 0 : index
      %c0_16 = arith.constant 0 : index
      %19 = vector.load %arg6[%c0_15, %c0_16] : memref<128x128xf32, #tpu.memory_space<vmem>>, vector<128x128xf32>
      tpu.vector_store %arg6[%c0_15, %c0_16], %18 {strides = array<i32>} : memref<128x128xf32, #tpu.memory_space<vmem>>, vector<128x128xf32>,
    } else {
    }
    return
  }
  func.func @transform_0(%arg0: i32, %arg1: i32) -> (i32, i32) {
    %c0_i32 = arith.constant 0 : i32
    return %arg0, %arg1 : i32, i32
  }
  func.func @transform_1(%arg0: i32, %arg1: i32) -> (i32, i32) {
    %c0_i32 = arith.constant 0 : i32
    %c0_i32_0 = arith.constant 0 : i32
    return %arg1, %c0_i32 : i32, i32
  }
  func.func @transform_2(%arg0: i32, %arg1: i32) -> (i32, i32) {
    %c0_i32 = arith.constant 0 : i32
    %c0_i32_0 = arith.constant 0 : i32
    return %arg0, %c0_i32 : i32, i32
  }
  func.func @transform_3(%arg0: i32, %arg1: i32) -> (i32, i32) {
    %c0_i32 = arith.constant 0 : i32
    %c0_i32_0 = arith.constant 0 : i32
    return %arg0, %c0_i32 : i32, i32
  }
  func.func @transform_4(%arg0: i32, %arg1: i32) -> (i32, i32) {
    %c0_i32 = arith.constant 0 : i32
    %c0_i32_0 = arith.constant 0 : i32
    return %arg0, %c0_i32 : i32, i32
  }
}

</mosaic_0001>

<bundles_post_ra>
// kernel: graphsage_forward.6
= control target key start
LH: loop header
LB: loop body
LE: loop exit
PB: predicated region body
PF: predicated region fallthrough
CT: control target
= control target key end

     0   :  { %v498_v3 = vmov 0.0   ;;  %s977_s1 = inlined_call_operand.vmem [shape: f32[128,256], index: 1, kind: input, shape index: {}]   ;;  %s978_s0 = inlined_call_operand.vmem [shape: f32[256,128], index: 0, kind: input, shape index: {}]   ;;  %s979_s2 = inlined_call_operand.vmem [shape: f32[1,128], index: 2, kind: input, shape index: {}]   ;;  %s980_s3 = inlined_call_operand.vmem [shape: f32[256,128], index: 3, kind: output, shape index: {0}]   ;;  %s981_s4 = inlined_call_operand.vmem [shape: f32[256,128], index: 4, kind: output, shape index: {1}]  }
   0x1   :  { %v49_v0 = vld [vmem:[%s977_s1 + $0x8] sm:$0xff]  ;;  %v51_v1 = vld [vmem:[%s977_s1 + $0x18] sm:$0xff]  ;;  %v48_v2 = vld [vmem:[%s977_s1] sm:$0xff]  ;;  %144 = vmatprep.mubr.f32.mxu0 %v498_v3  ;;  %240 = vmatprep.mubr.f32.mxu1 %v498_v3 }
   0x2   :  { %v449_v4 = vpack.c.bf16 %v51_v1, %v49_v0  ;;  %v50_v5 = vld [vmem:[%s977_s1 + $0x10] sm:$0xff]  ;;  %v53_v6 = vld [vmem:[%s977_s1 + $0x28] sm:$0xff]  ;;  %v55_v7 = vld [vmem:[%s977_s1 + $0x38] sm:$0xff] }
   0x3   :  { %v451_v8 = vpack.c.bf16 %v50_v5, %v48_v2  ;;  %v453_v9 = vpack.c.bf16 %v55_v7, %v53_v6  ;;  %v52_v10 = vld [vmem:[%s977_s1 + $0x20] sm:$0xff]  ;;  %v54_v11 = vld [vmem:[%s977_s1 + $0x30] sm:$0xff]  ;;  %v57_v12 = vld [vmem:[%s977_s1 + $0x48] sm:$0xff] }
   0x4   :  { %450 = vmatprep.subr.bf16.mxu0 %v449_v4  ;;  %481 = vmatprep.subr.bf16.mxu1 %v449_v4  ;;  %v59_v13 = vld [vmem:[%s977_s1 + $0x58] sm:$0xff]  ;;  %v455_v14 = vpack.c.bf16 %v54_v11, %v52_v10  ;;  %v56_v16 = vld [vmem:[%s977_s1 + $0x40] sm:$0xff]  ;;  %v58_v17 = vld [vmem:[%s977_s1 + $0x50] sm:$0xff] }
   0x5   :  { %452 = vmatpush1.bf16.msra.mxu0 %v451_v8  ;;  %489 = vmatpush1.bf16.msra.mxu1 %v451_v8  ;;  %v457_v15 = vpack.c.bf16 %v59_v13, %v57_v12  ;;  %v61_v18 = vld [vmem:[%s977_s1 + $0x68] sm:$0xff]  ;;  %v63_v19 = vld [vmem:[%s977_s1 + $0x78] sm:$0xff]  ;;  %v459_v20 = vpack.c.bf16 %v58_v17, %v56_v16  ;;  %v60_v22 = vld [vmem:[%s977_s1 + $0x60] sm:$0xff] }
   0x6   :  { %454 = vmatprep.subr.bf16.mxu0 %v453_v9  ;;  %482 = vmatprep.subr.bf16.mxu1 %v453_v9  ;;  %v461_v21 = vpack.c.bf16 %v63_v19, %v61_v18  ;;  %v62_v23 = vld [vmem:[%s977_s1 + $0x70] sm:$0xff]  ;;  %v65_v24 = vld [vmem:[%s977_s1 + $0x88] sm:$0xff]  ;;  %v67_v25 = vld [vmem:[%s977_s1 + $0x98] sm:$0xff] }
   0x7   :  { %v463_v26 = vpack.c.bf16 %v62_v23, %v60_v22  ;;  %v465_v27 = vpack.c.bf16 %v67_v25, %v65_v24  ;;  %v64_v28 = vld [vmem:[%s977_s1 + $0x80] sm:$0xff]  ;;  %v66_v29 = vld [vmem:[%s977_s1 + $0x90] sm:$0xff]  ;;  %v69_v30 = vld [vmem:[%s977_s1 + $0xa8] sm:$0xff] }
   0x8   :  { %v71_v31 = vld [vmem:[%s977_s1 + $0xb8] sm:$0xff]  ;;  %v467_v32 = vpack.c.bf16 %v66_v29, %v64_v28  ;;  %v68_v34 = vld [vmem:[%s977_s1 + $0xa0] sm:$0xff]  ;;  %v70_v35 = vld [vmem:[%s977_s1 + $0xb0] sm:$0xff] }
   0x9   :  { %456 = vmatpush1.bf16.msra.mxu0 %v455_v14  ;;  %490 = vmatpush1.bf16.msra.mxu1 %v455_v14  ;;  %v469_v33 = vpack.c.bf16 %v71_v31, %v69_v30  ;;  %v73_v36 = vld [vmem:[%s977_s1 + $0xc8] sm:$0xff]  ;;  %v75_v37 = vld [vmem:[%s977_s1 + $0xd8] sm:$0xff]  ;;  %v471_v38 = vpack.c.bf16 %v70_v35, %v68_v34  ;;  %v72_v40 = vld [vmem:[%s977_s1 + $0xc0] sm:$0xff] }
   0xa   :  { %458 = vmatprep.subr.bf16.mxu0 %v457_v15  ;;  %483 = vmatprep.subr.bf16.mxu1 %v457_v15  ;;  %v473_v39 = vpack.c.bf16 %v75_v37, %v73_v36  ;;  %v74_v41 = vld [vmem:[%s977_s1 + $0xd0] sm:$0xff]  ;;  %v77_v42 = vld [vmem:[%s977_s1 + $0xe8] sm:$0xff]  ;;  %v79_v43 = vld [vmem:[%s977_s1 + $0xf8] sm:$0xff] }
   0xb   :  { %v475_v44 = vpack.c.bf16 %v74_v41, %v72_v40  ;;  %v477_v45 = vpack.c.bf16 %v79_v43, %v77_v42  ;;  %v76_v46 = vld [vmem:[%s977_s1 + $0xe0] sm:$0xff]  ;;  %v78_v47 = vld [vmem:[%s977_s1 + $0xf0] sm:$0xff]  ;;  %v17_v51 = vld [vmem:[%s978_s0 + $0x8] sm:$0xff] }
   0xc   :  { %v479_v48 = vpack.c.bf16 %v78_v47, %v76_v46  ;;  %v16_v49 = vld [vmem:[%s978_s0] sm:$0xff]  ;;  %v33_v52 = vld [vmem:[%s978_s0 + $0x88] sm:$0xff]  ;;  %v18_v53 = vld [vmem:[%s978_s0 + $0x10] sm:$0xff] }
   0xd   :  { %460 = vmatpush1.bf16.msra.mxu0 %v459_v20  ;;  %491 = vmatpush1.bf16.msra.mxu1 %v459_v20  ;;  %v32_v50 = vld [vmem:[%s978_s0 + $0x80] sm:$0xff]  ;;  %v34_v54 = vld [vmem:[%s978_s0 + $0x90] sm:$0xff]  ;;  %v19_v55 = vld [vmem:[%s978_s0 + $0x18] sm:$0xff] }
   0xe   :  { %462 = vmatprep.subr.bf16.mxu0 %v461_v21  ;;  %484 = vmatprep.subr.bf16.mxu1 %v461_v21  ;;  %v35_v56 = vld [vmem:[%s978_s0 + $0x98] sm:$0xff]  ;;  %v20_v57 = vld [vmem:[%s978_s0 + $0x20] sm:$0xff]  ;;  %v21_v59 = vld [vmem:[%s978_s0 + $0x28] sm:$0xff] }
   0xf   :  { %v36_v58 = vld [vmem:[%s978_s0 + $0xa0] sm:$0xff]  ;;  %v37_v60 = vld [vmem:[%s978_s0 + $0xa8] sm:$0xff]  ;;  %v22_v61 = vld [vmem:[%s978_s0 + $0x30] sm:$0xff] }
  0x10   :  { %v38_v62 = vld [vmem:[%s978_s0 + $0xb0] sm:$0xff]  ;;  %v23_v63 = vld [vmem:[%s978_s0 + $0x38] sm:$0xff]  ;;  %v24_v1 = vld [vmem:[%s978_s0 + $0x40] sm:$0xff] }
  0x11   :  { %464 = vmatpush1.bf16.msra.mxu0 %v463_v26  ;;  %492 = vmatpush1.bf16.msra.mxu1 %v463_v26  ;;  %v39_v0 = vld [vmem:[%s978_s0 + $0xb8] sm:$0xff]  ;;  %v40_v2 = vld [vmem:[%s978_s0 + $0xc0] sm:$0xff]  ;;  %v25_v4 = vld [vmem:[%s978_s0 + $0x48] sm:$0xff] }
  0x12   :  { %466 = vmatprep.subr.bf16.mxu0 %v465_v27  ;;  %485 = vmatprep.subr.bf16.mxu1 %v465_v27  ;;  %v41_v5 = vld [vmem:[%s978_s0 + $0xc8] sm:$0xff]  ;;  %v26_v6 = vld [vmem:[%s978_s0 + $0x50] sm:$0xff]  ;;  %v27_v8 = vld [vmem:[%s978_s0 + $0x58] sm:$0xff] }
  0x13   :  { %v42_v7 = vld [vmem:[%s978_s0 + $0xd0] sm:$0xff]  ;;  %v43_v9 = vld [vmem:[%s978_s0 + $0xd8] sm:$0xff]  ;;  %v28_v10 = vld [vmem:[%s978_s0 + $0x60] sm:$0xff] }
  0x14   :  { %v44_v11 = vld [vmem:[%s978_s0 + $0xe0] sm:$0xff]  ;;  %v29_v12 = vld [vmem:[%s978_s0 + $0x68] sm:$0xff]  ;;  %v30_v14 = vld [vmem:[%s978_s0 + $0x70] sm:$0xff] }
  0x15   :  { %468 = vmatpush1.bf16.msra.mxu0 %v467_v32  ;;  %493 = vmatpush1.bf16.msra.mxu1 %v467_v32  ;;  %v45_v13 = vld [vmem:[%s978_s0 + $0xe8] sm:$0xff]  ;;  %v46_v15 = vld [vmem:[%s978_s0 + $0xf0] sm:$0xff]  ;;  %v31_v16 = vld [vmem:[%s978_s0 + $0x78] sm:$0xff] }
  0x16   :  { %470 = vmatprep.subr.bf16.mxu0 %v469_v33  ;;  %486 = vmatprep.subr.bf16.mxu1 %v469_v33  ;;  %v47_v17 = vld [vmem:[%s978_s0 + $0xf8] sm:$0xff]  ;;  %v751_v18 = vld [vmem:[%s979_s2] ss:$0 sm:$0xff] }
  0x19   :  { %472 = vmatpush1.bf16.msra.mxu0 %v471_v38  ;;  %494 = vmatpush1.bf16.msra.mxu1 %v471_v38 }
  0x1a   :  { %474 = vmatprep.subr.bf16.mxu0 %v473_v39  ;;  %487 = vmatprep.subr.bf16.mxu1 %v473_v39 }
  0x1d   :  { %476 = vmatpush1.bf16.msra.mxu0 %v475_v44  ;;  %495 = vmatpush1.bf16.msra.mxu1 %v475_v44 }
  0x1e   :  { %478 = vmatprep.subr.bf16.mxu0 %v477_v45  ;;  %488 = vmatprep.subr.bf16.mxu1 %v477_v45 }
  0x21   :  { %480 = vmatpush1.bf16.msra.mxu0 %v479_v48  ;;  %496 = vmatpush1.bf16.msra.mxu1 %v479_v48 }
  0x24   :  { %145 = vmatmul.mubr.f32.vlgmr.msra.gmra.mrb[0].mxu0 %v16_v49  ;;  %241 = vmatmul.mubr.f32.vlgmr.msra.gmra.mrb[0].mxu1 %v32_v50 }
  0x25   :  { %150 = vmatprep.mubr.f32.mxu0 %v498_v3  ;;  %246 = vmatprep.mubr.f32.mxu1 %v498_v3 }
  0x28   :  { %151 = vmatmul.mubr.f32.gmra.mrb[2].mxu0 %v17_v51  ;;  %247 = vmatmul.mubr.f32.gmra.mrb[2].mxu1 %v33_v52 }
  0x29   :  { %156 = vmatprep.mubr.f32.mxu0 %v498_v3  ;;  %252 = vmatprep.mubr.f32.mxu1 %v498_v3 }
  0x2c   :  { %157 = vmatmul.mubr.f32.gmra.mrb[4].mxu0 %v18_v53  ;;  %253 = vmatmul.mubr.f32.gmra.mrb[4].mxu1 %v34_v54 }
  0x2d   :  { %162 = vmatprep.mubr.f32.mxu0 %v498_v3  ;;  %258 = vmatprep.mubr.f32.mxu1 %v498_v3 }
  0x30   :  { %163 = vmatmul.mubr.f32.gmra.mrb[6].mxu0 %v19_v55  ;;  %259 = vmatmul.mubr.f32.gmra.mrb[6].mxu1 %v35_v56 }
  0x31   :  { %168 = vmatprep.mubr.f32.mxu0 %v498_v3  ;;  %264 = vmatprep.mubr.f32.mxu1 %v498_v3 }
  0x34   :  { %169 = vmatmul.mubr.f32.gmra.mrb[8].mxu0 %v20_v57  ;;  %265 = vmatmul.mubr.f32.gmra.mrb[8].mxu1 %v36_v58 }
  0x35   :  { %174 = vmatprep.mubr.f32.mxu0 %v498_v3  ;;  %270 = vmatprep.mubr.f32.mxu1 %v498_v3 }
  0x38   :  { %175 = vmatmul.mubr.f32.gmra.mrb[10].mxu0 %v21_v59  ;;  %271 = vmatmul.mubr.f32.gmra.mrb[10].mxu1 %v37_v60 }
  0x39   :  { %180 = vmatprep.mubr.f32.mxu0 %v498_v3  ;;  %276 = vmatprep.mubr.f32.mxu1 %v498_v3 }
  0x3c   :  { %181 = vmatmul.mubr.f32.gmra.mrb[12].mxu0 %v22_v61  ;;  %277 = vmatmul.mubr.f32.gmra.mrb[12].mxu1 %v38_v62 }
  0x3d   :  { %186 = vmatprep.mubr.f32.mxu0 %v498_v3  ;;  %282 = vmatprep.mubr.f32.mxu1 %v498_v3 }
  0x40   :  { %187 = vmatmul.mubr.f32.gmra.mrb[14].mxu0 %v23_v63  ;;  %283 = vmatmul.mubr.f32.gmra.mrb[14].mxu1 %v39_v0 }
  0x41   :  { %192 = vmatprep.mubr.f32.mxu0 %v498_v3  ;;  %288 = vmatprep.mubr.f32.mxu1 %v498_v3 }
  0x44   :  { %193 = vmatmul.mubr.f32.gmra.mrb[16].mxu0 %v24_v1  ;;  %289 = vmatmul.mubr.f32.gmra.mrb[16].mxu1 %v40_v2 }
  0x45   :  { %198 = vmatprep.mubr.f32.mxu0 %v498_v3  ;;  %294 = vmatprep.mubr.f32.mxu1 %v498_v3 }
  0x48   :  { %199 = vmatmul.mubr.f32.gmra.mrb[18].mxu0 %v25_v4  ;;  %295 = vmatmul.mubr.f32.gmra.mrb[18].mxu1 %v41_v5 }
  0x49   :  { %204 = vmatprep.mubr.f32.mxu0 %v498_v3  ;;  %300 = vmatprep.mubr.f32.mxu1 %v498_v3 }
  0x4c   :  { %205 = vmatmul.mubr.f32.gmra.mrb[20].mxu0 %v26_v6  ;;  %301 = vmatmul.mubr.f32.gmra.mrb[20].mxu1 %v42_v7 }
  0x4d   :  { %210 = vmatprep.mubr.f32.mxu0 %v498_v3  ;;  %306 = vmatprep.mubr.f32.mxu1 %v498_v3 }
  0x50   :  { %211 = vmatmul.mubr.f32.gmra.mrb[22].mxu0 %v27_v8  ;;  %307 = vmatmul.mubr.f32.gmra.mrb[22].mxu1 %v43_v9 }
  0x51   :  { %216 = vmatprep.mubr.f32.mxu0 %v498_v3  ;;  %312 = vmatprep.mubr.f32.mxu1 %v498_v3 }
  0x54   :  { %217 = vmatmul.mubr.f32.gmra.mrb[24].mxu0 %v28_v10  ;;  %313 = vmatmul.mubr.f32.gmra.mrb[24].mxu1 %v44_v11 }
  0x55   :  { %222 = vmatprep.mubr.f32.mxu0 %v498_v3  ;;  %318 = vmatprep.mubr.f32.mxu1 %v498_v3 }
  0x58   :  { %223 = vmatmul.mubr.f32.gmra.mrb[26].mxu0 %v29_v12  ;;  %319 = vmatmul.mubr.f32.gmra.mrb[26].mxu1 %v45_v13 }
  0x59   :  { %228 = vmatprep.mubr.f32.mxu0 %v498_v3  ;;  %324 = vmatprep.mubr.f32.mxu1 %v498_v3 }
  0x5c   :  { %229 = vmatmul.mubr.f32.gmra.mrb[28].mxu0 %v30_v14  ;;  %325 = vmatmul.mubr.f32.gmra.mrb[28].mxu1 %v46_v15 }
  0x5d   :  { %234 = vmatprep.mubr.f32.mxu0 %v498_v3  ;;  %330 = vmatprep.mubr.f32.mxu1 %v498_v3 }
  0x60   :  { %235 = vmatmul.mubr.f32.gmra.mrb[30].mxu0 %v31_v16  ;;  %331 = vmatmul.mubr.f32.gmra.mrb[30].mxu1 %v47_v17 }
  0xf7   :  { %v146_v19 = vpop.f32.mrb[0].mxu0  ;;  %v242_v20 = vpop.f32.mrb[0].mxu1 }
  0xf8   :  { %337 = vst [vmem:[%s980_s3] sm:$0xff] %v146_v19  ;;  %353 = vst [vmem:[%s980_s3 + $0x80] sm:$0xff] %v242_v20  ;;  %v148_v3 = vpop.f32.mrb[1].mxu0  ;;  %v244_v21 = vpop.f32.mrb[1].mxu1 }
  0xf9   :  { %v376_v22 = vadd.f32 %v751_v18, %v148_v3  ;;  %v392_v23 = vadd.f32 %v751_v18, %v244_v21 }
  0xfb   :  { %408 = vst [vmem:[%s981_s4] sm:$0xff] %v376_v22  ;;  %424 = vst [vmem:[%s981_s4 + $0x80] sm:$0xff] %v392_v23  ;;  %v152_v24 = vpop.f32.mrb[2].mxu0  ;;  %v248_v25 = vpop.f32.mrb[2].mxu1 }
  0xfc   :  { %338 = vst [vmem:[%s980_s3 + $0x8] sm:$0xff] %v152_v24  ;;  %354 = vst [vmem:[%s980_s3 + $0x88] sm:$0xff] %v248_v25  ;;  %v154_v26 = vpop.f32.mrb[3].mxu0  ;;  %v250_v27 = vpop.f32.mrb[3].mxu1 }
  0xfd   :  { %v377_v28 = vadd.f32 %v751_v18, %v154_v26  ;;  %v393_v29 = vadd.f32 %v751_v18, %v250_v27 }
  0xff   :  { %409 = vst [vmem:[%s981_s4 + $0x8] sm:$0xff] %v377_v28  ;;  %425 = vst [vmem:[%s981_s4 + $0x88] sm:$0xff] %v393_v29  ;;  %v158_v30 = vpop.f32.mrb[4].mxu0  ;;  %v254_v31 = vpop.f32.mrb[4].mxu1 }
 0x100   :  { %339 = vst [vmem:[%s980_s3 + $0x10] sm:$0xff] %v158_v30  ;;  %355 = vst [vmem:[%s980_s3 + $0x90] sm:$0xff] %v254_v31  ;;  %v160_v32 = vpop.f32.mrb[5].mxu0  ;;  %v256_v33 = vpop.f32.mrb[5].mxu1 }
 0x101   :  { %v378_v34 = vadd.f32 %v751_v18, %v160_v32  ;;  %v394_v35 = vadd.f32 %v751_v18, %v256_v33 }
 0x103   :  { %410 = vst [vmem:[%s981_s4 + $0x10] sm:$0xff] %v378_v34  ;;  %426 = vst [vmem:[%s981_s4 + $0x90] sm:$0xff] %v394_v35  ;;  %v164_v36 = vpop.f32.mrb[6].mxu0  ;;  %v260_v37 = vpop.f32.mrb[6].mxu1 }
 0x104   :  { %340 = vst [vmem:[%s980_s3 + $0x18] sm:$0xff] %v164_v36  ;;  %356 = vst [vmem:[%s980_s3 + $0x98] sm:$0xff] %v260_v37  ;;  %v166_v38 = vpop.f32.mrb[7].mxu0  ;;  %v262_v39 = vpop.f32.mrb[7].mxu1 }
 0x105   :  { %v379_v40 = vadd.f32 %v751_v18, %v166_v38  ;;  %v395_v41 = vadd.f32 %v751_v18, %v262_v39 }
 0x107   :  { %411 = vst [vmem:[%s981_s4 + $0x18] sm:$0xff] %v379_v40  ;;  %427 = vst [vmem:[%s981_s4 + $0x98] sm:$0xff] %v395_v41  ;;  %v170_v42 = vpop.f32.mrb[8].mxu0  ;;  %v266_v43 = vpop.f32.mrb[8].mxu1 }
 0x108   :  { %341 = vst [vmem:[%s980_s3 + $0x20] sm:$0xff] %v170_v42  ;;  %357 = vst [vmem:[%s980_s3 + $0xa0] sm:$0xff] %v266_v43  ;;  %v172_v44 = vpop.f32.mrb[9].mxu0  ;;  %v268_v45 = vpop.f32.mrb[9].mxu1 }
 0x109   :  { %v380_v46 = vadd.f32 %v751_v18, %v172_v44  ;;  %v396_v47 = vadd.f32 %v751_v18, %v268_v45 }
 0x10b   :  { %412 = vst [vmem:[%s981_s4 + $0x20] sm:$0xff] %v380_v46  ;;  %428 = vst [vmem:[%s981_s4 + $0xa0] sm:$0xff] %v396_v47  ;;  %v176_v48 = vpop.f32.mrb[10].mxu0  ;;  %v272_v49 = vpop.f32.mrb[10].mxu1 }
 0x10c   :  { %342 = vst [vmem:[%s980_s3 + $0x28] sm:$0xff] %v176_v48  ;;  %358 = vst [vmem:[%s980_s3 + $0xa8] sm:$0xff] %v272_v49  ;;  %v178_v50 = vpop.f32.mrb[11].mxu0  ;;  %v274_v51 = vpop.f32.mrb[11].mxu1 }
 0x10d   :  { %v381_v52 = vadd.f32 %v751_v18, %v178_v50  ;;  %v397_v53 = vadd.f32 %v751_v18, %v274_v51 }
 0x10f   :  { %413 = vst [vmem:[%s981_s4 + $0x28] sm:$0xff] %v381_v52  ;;  %429 = vst [vmem:[%s981_s4 + $0xa8] sm:$0xff] %v397_v53  ;;  %v182_v54 = vpop.f32.mrb[12].mxu0  ;;  %v278_v55 = vpop.f32.mrb[12].mxu1 }
 0x110   :  { %343 = vst [vmem:[%s980_s3 + $0x30] sm:$0xff] %v182_v54  ;;  %359 = vst [vmem:[%s980_s3 + $0xb0] sm:$0xff] %v278_v55  ;;  %v184_v56 = vpop.f32.mrb[13].mxu0  ;;  %v280_v57 = vpop.f32.mrb[13].mxu1 }
 0x111   :  { %v382_v58 = vadd.f32 %v751_v18, %v184_v56  ;;  %v398_v59 = vadd.f32 %v751_v18, %v280_v57 }
 0x113   :  { %414 = vst [vmem:[%s981_s4 + $0x30] sm:$0xff] %v382_v58  ;;  %430 = vst [vmem:[%s981_s4 + $0xb0] sm:$0xff] %v398_v59  ;;  %v188_v60 = vpop.f32.mrb[14].mxu0  ;;  %v284_v61 = vpop.f32.mrb[14].mxu1 }
 0x114   :  { %344 = vst [vmem:[%s980_s3 + $0x38] sm:$0xff] %v188_v60  ;;  %360 = vst [vmem:[%s980_s3 + $0xb8] sm:$0xff] %v284_v61  ;;  %v190_v62 = vpop.f32.mrb[15].mxu0  ;;  %v286_v63 = vpop.f32.mrb[15].mxu1 }
 0x115   :  { %v383_v0 = vadd.f32 %v751_v18, %v190_v62  ;;  %v399_v1 = vadd.f32 %v751_v18, %v286_v63 }
 0x117   :  { %415 = vst [vmem:[%s981_s4 + $0x38] sm:$0xff] %v383_v0  ;;  %431 = vst [vmem:[%s981_s4 + $0xb8] sm:$0xff] %v399_v1  ;;  %v194_v2 = vpop.f32.mrb[16].mxu0  ;;  %v290_v4 = vpop.f32.mrb[16].mxu1 }
 0x118   :  { %345 = vst [vmem:[%s980_s3 + $0x40] sm:$0xff] %v194_v2  ;;  %361 = vst [vmem:[%s980_s3 + $0xc0] sm:$0xff] %v290_v4  ;;  %v196_v5 = vpop.f32.mrb[17].mxu0  ;;  %v292_v6 = vpop.f32.mrb[17].mxu1 }
 0x119   :  { %v384_v7 = vadd.f32 %v751_v18, %v196_v5  ;;  %v400_v8 = vadd.f32 %v751_v18, %v292_v6 }
 0x11b   :  { %416 = vst [vmem:[%s981_s4 + $0x40] sm:$0xff] %v384_v7  ;;  %432 = vst [vmem:[%s981_s4 + $0xc0] sm:$0xff] %v400_v8  ;;  %v200_v9 = vpop.f32.mrb[18].mxu0  ;;  %v296_v10 = vpop.f32.mrb[18].mxu1 }
 0x11c   :  { %346 = vst [vmem:[%s980_s3 + $0x48] sm:$0xff] %v200_v9  ;;  %362 = vst [vmem:[%s980_s3 + $0xc8] sm:$0xff] %v296_v10  ;;  %v202_v11 = vpop.f32.mrb[19].mxu0  ;;  %v298_v12 = vpop.f32.mrb[19].mxu1 }
 0x11d   :  { %v385_v13 = vadd.f32 %v751_v18, %v202_v11  ;;  %v401_v14 = vadd.f32 %v751_v18, %v298_v12 }
 0x11f   :  { %417 = vst [vmem:[%s981_s4 + $0x48] sm:$0xff] %v385_v13  ;;  %433 = vst [vmem:[%s981_s4 + $0xc8] sm:$0xff] %v401_v14  ;;  %v206_v15 = vpop.f32.mrb[20].mxu0  ;;  %v302_v16 = vpop.f32.mrb[20].mxu1 }
 0x120   :  { %347 = vst [vmem:[%s980_s3 + $0x50] sm:$0xff] %v206_v15  ;;  %363 = vst [vmem:[%s980_s3 + $0xd0] sm:$0xff] %v302_v16  ;;  %v208_v17 = vpop.f32.mrb[21].mxu0  ;;  %v304_v19 = vpop.f32.mrb[21].mxu1 }
 0x121   :  { %v386_v20 = vadd.f32 %v751_v18, %v208_v17  ;;  %v402_v3 = vadd.f32 %v751_v18, %v304_v19 }
 0x123   :  { %418 = vst [vmem:[%s981_s4 + $0x50] sm:$0xff] %v386_v20  ;;  %434 = vst [vmem:[%s981_s4 + $0xd0] sm:$0xff] %v402_v3  ;;  %v212_v21 = vpop.f32.mrb[22].mxu0  ;;  %v308_v22 = vpop.f32.mrb[22].mxu1 }
 0x124   :  { %348 = vst [vmem:[%s980_s3 + $0x58] sm:$0xff] %v212_v21  ;;  %364 = vst [vmem:[%s980_s3 + $0xd8] sm:$0xff] %v308_v22  ;;  %v214_v23 = vpop.f32.mrb[23].mxu0  ;;  %v310_v24 = vpop.f32.mrb[23].mxu1 }
 0x125   :  { %v387_v25 = vadd.f32 %v751_v18, %v214_v23  ;;  %v403_v26 = vadd.f32 %v751_v18, %v310_v24 }
 0x127   :  { %419 = vst [vmem:[%s981_s4 + $0x58] sm:$0xff] %v387_v25  ;;  %435 = vst [vmem:[%s981_s4 + $0xd8] sm:$0xff] %v403_v26  ;;  %v218_v27 = vpop.f32.mrb[24].mxu0  ;;  %v314_v28 = vpop.f32.mrb[24].mxu1 }
 0x128   :  { %349 = vst [vmem:[%s980_s3 + $0x60] sm:$0xff] %v218_v27  ;;  %365 = vst [vmem:[%s980_s3 + $0xe0] sm:$0xff] %v314_v28  ;;  %v220_v29 = vpop.f32.mrb[25].mxu0  ;;  %v316_v30 = vpop.f32.mrb[25].mxu1 }
 0x129   :  { %v388_v31 = vadd.f32 %v751_v18, %v220_v29  ;;  %v404_v32 = vadd.f32 %v751_v18, %v316_v30 }
 0x12b   :  { %420 = vst [vmem:[%s981_s4 + $0x60] sm:$0xff] %v388_v31  ;;  %436 = vst [vmem:[%s981_s4 + $0xe0] sm:$0xff] %v404_v32  ;;  %v224_v33 = vpop.f32.mrb[26].mxu0  ;;  %v320_v34 = vpop.f32.mrb[26].mxu1 }
 0x12c   :  { %350 = vst [vmem:[%s980_s3 + $0x68] sm:$0xff] %v224_v33  ;;  %366 = vst [vmem:[%s980_s3 + $0xe8] sm:$0xff] %v320_v34  ;;  %v226_v35 = vpop.f32.mrb[27].mxu0  ;;  %v322_v36 = vpop.f32.mrb[27].mxu1 }
 0x12d   :  { %v389_v37 = vadd.f32 %v751_v18, %v226_v35  ;;  %v405_v38 = vadd.f32 %v751_v18, %v322_v36 }
 0x12f   :  { %421 = vst [vmem:[%s981_s4 + $0x68] sm:$0xff] %v389_v37  ;;  %437 = vst [vmem:[%s981_s4 + $0xe8] sm:$0xff] %v405_v38  ;;  %v230_v39 = vpop.f32.mrb[28].mxu0  ;;  %v326_v40 = vpop.f32.mrb[28].mxu1 }
 0x130   :  { %351 = vst [vmem:[%s980_s3 + $0x70] sm:$0xff] %v230_v39  ;;  %367 = vst [vmem:[%s980_s3 + $0xf0] sm:$0xff] %v326_v40  ;;  %v232_v41 = vpop.f32.mrb[29].mxu0  ;;  %v328_v42 = vpop.f32.mrb[29].mxu1 }
 0x131   :  { %v390_v43 = vadd.f32 %v751_v18, %v232_v41  ;;  %v406_v44 = vadd.f32 %v751_v18, %v328_v42 }
 0x133   :  { %422 = vst [vmem:[%s981_s4 + $0x70] sm:$0xff] %v390_v43  ;;  %438 = vst [vmem:[%s981_s4 + $0xf0] sm:$0xff] %v406_v44  ;;  %v236_v45 = vpop.f32.mrb[30].mxu0  ;;  %v332_v46 = vpop.f32.mrb[30].mxu1 }
 0x134   :  { %352 = vst [vmem:[%s980_s3 + $0x78] sm:$0xff] %v236_v45  ;;  %368 = vst [vmem:[%s980_s3 + $0xf8] sm:$0xff] %v332_v46  ;;  %v238_v47 = vpop.f32.mrb[31].mxu0  ;;  %v334_v48 = vpop.f32.mrb[31].mxu1 }
 0x135   :  { %v391_v49 = vadd.f32 %v751_v18, %v238_v47  ;;  %v407_v50 = vadd.f32 %v751_v18, %v334_v48 }
 0x137   :  { %423 = vst [vmem:[%s981_s4 + $0x78] sm:$0xff] %v391_v49  ;;  %439 = vst [vmem:[%s981_s4 + $0xf8] sm:$0xff] %v407_v50 }

// kernel: graphsage_forward.7
= control target key start
LH: loop header
LB: loop body
LE: loop exit
PB: predicated region body
PF: predicated region fallthrough
CT: control target
= control target key end

     0   :  { %s1188_s15 = smov 0   ;;  %s1190_s16 = smov 0   ;;  %s1378_s0 = inlined_call_operand.vmem [shape: s8[256,256], index: 0, kind: input, shape index: {}]   ;;  %s1379_s1 = inlined_call_operand.vmem [shape: f32[256,128], index: 1, kind: input, shape index: {}]   ;;  %s1380_s2 = inlined_call_operand.vmem [shape: f32[256,128], index: 2, kind: input, shape index: {}]   ;;  %s1381_s3 = inlined_call_operand.vmem [shape: f32[256,1], index: 3, kind: input, shape index: {}]   ;;  %s1382_s4 = inlined_call_operand.vmem [shape: f32[256,128], index: 4, kind: output, shape index: {}]  }
   0x1   :  { %s1192_s17 = smov 0   ;;  %s1194_s18 = smov 0  }
   0x2   :  { %s1196_s19 = smov 0   ;;  %s1198_s20 = smov 0  }
   0x3   :  { %s1200_s21 = smov 0  }
   0x4 LB: > { %s23_s22 = sadd.s32 1, %s1151_s19  ;;  %s26_s23 = sadd.s32 1, %s1155_s20  ;;  %s1159_s21 = sphi %s1200_s21, %s14_s21   ;;  %s1155_s20 = sphi %s1198_s20, %s1388_s20   ;;  %s1151_s19 = sphi %s1196_s19, %s1387_s19   ;;  %s1147_s18 = sphi %s1194_s18, %s1386_s18   ;;  %s1143_s17 = sphi %s1192_s17, %s1385_s17   ;;  %s1139_s16 = sphi %s1190_s16, %s1384_s16   ;;  %s1135_s15 = sphi %s1188_s15, %s1383_s15  }
   0x5   : > { %p24_p0 = scmp.ge.s32.totalorder %s23_s22, 2  ;;  %p42_p1 = scmp.ne.s32.totalorder %s1139_s16, %s1135_s15 }
   0x6   : > { %p43_p2 = scmp.eq.s32.totalorder %s1159_s21, 0  ;;  %s35_s27 = sadd.s32 1, %s1139_s16 }
   0x7   : > { %s1390_s22 = smov (%p24_p0, %s23_s22), 0  ;;  %s1392_s23 = smov (!%p24_p0, %s26_s23), %s1155_s20 }
   0x8   : > { %p44_p3 = por %p43_p2, %p42_p1  ;;  %p28_p4 = scmp.ge.s32.totalorder %s1392_s23, 2 }
   0x9   : > { %s31_s24 = ssub.s32 %s1151_s19, %s1390_s22  ;;  %p889_p6 = scmp.ge.s32.totalorder %s1159_s21, 4 }
   0xa   : > { %s1394_s23 = smov (%p28_p4, %s1392_s23), 0 }
   0xb   : > { %s30_s25 = ssub.s32 %s1155_s20, %s1394_s23  ;;  %172 = sbr.rel (%p889_p6) target bundleno = 26 (0x1a), region = 16 }
   0xc   : > { %s32_s26 = sor.u32 %s31_s24, %s30_s25 }
   0xd   : > { %p33_p5 = scmp.eq.s32.totalorder %s32_s26, 0 }
   0xf   : > { %s1239_s28 = scalar_select %p33_p5, %s1139_s16, %s35_s27  }
  0x12   : > { %175 = sbr.rel (!%p44_p3) target bundleno = 26 (0x1a), region = 20  ;;  %s177_s29 = sand.u32 (%p44_p3), 1, %s1139_s16  }
  0x13   : > { %s908_s30 = sshll.u32 (%p44_p3), %s1155_s20, 3  ;;  %s890_s5 = sshll.u32 (%p44_p3), %s177_s29, 5 }
  0x14   : > { %s182_s6 = sadd.s32 (%p44_p3), %s1151_s19, %s908_s30  ;;  %s179_s11 = scalar_lea.vmem (%p44_p3), [#allocation3], %s890_s5 }
  0x15   : > { %s893_s7 = sshll.u32 (%p44_p3), %s182_s6, 3 }
  0x16   : > { %s184_s10 = scalar_lea.vmem (%p44_p3), %s1378_s0, %s893_s7 }
  0x17   : > { %v218_v0 = vld [vmem:[%s184_s10] sm:$0xff] (%p44_p3)  ;;  %v220_v1 = vld [vmem:[%s184_s10 + $0x10] sm:$0xff] (%p44_p3) }
  0x18   : > { %v222_v2 = vld [vmem:[%s184_s10 + $0x20] sm:$0xff] (%p44_p3)  ;;  %219 = vst [vmem:[%s179_s11] sm:$0xff] (%p44_p3), %v218_v0  ;;  %221 = vst [vmem:[%s179_s11 + $0x8] sm:$0xff] (%p44_p3), %v220_v1  ;;  %v224_v3 = vld [vmem:[%s184_s10 + $0x30] sm:$0xff] (%p44_p3) }
  0x19   : > { %223 = vst [vmem:[%s179_s11 + $0x10] sm:$0xff] %v222_v2  ;;  %225 = vst [vmem:[%s179_s11 + $0x18] sm:$0xff] %v224_v3 }
  0x1a PF: > { %p894_p7 = scmp.ge.s32.totalorder %s1159_s21, 1  ;;  %p257_p8 = scmp.lt.s32.totalorder %s1159_s21, 5 }
  0x1c   : > { %p258_p9 = pnand %p894_p7, %p257_p8 }
  0x1d   : > { %s264_s12 = sand.u32 (!%p258_p9), 1, %s1135_s15   ;;  %s896_s13 = sshll.u32 (!%p258_p9), %s1143_s17, 4 }
  0x1e   : > { %261 = sbr.rel (%p258_p9) target bundleno = 429 (0x1ad), region = 70  ;;  %s895_s14 = sshll.u32 (!%p258_p9), %s264_s12, 5 }
  0x1f   : > { %p306_p10 = scmp.lt.s32.totalorder (!%p258_p9), %s896_s13, 31  ;;  %s898_s24 = sshll.u32 (!%p258_p9), %s1147_s18, 4 }
  0x20   : > { %p312_p11 = scmp.lt.s32.totalorder (!%p258_p9), %s898_s24, 31  ;;  %s1273_s12 = scalar_lea.vmem (!%p258_p9), [#allocation3], %s895_s14 }
  0x21   : > { %p904_p12 = scmp.ne.s32.totalorder (!%p258_p9), %s1143_s17, 0 }
  0x25   : > { %s1396_s13 = smov (!%p306_p10, %s896_s13), 31  ;;  %s1398_s24 = smov (!%p312_p11, %s898_s24), 31 }
  0x26   : > { %s897_s25 = sshll.u32 %s1396_s13, 3  ;;  %s899_s30 = sshll.u32 %s1398_s24, 3  ;;  %v1161_v4 = vmov (!%p904_p12), 0.0  }
  0x27   : > { %s1256_s29 = scalar_lea.vmem %s1379_s1, %s897_s25  ;;  %s1261_s7 = scalar_lea.vmem %s1380_s2, %s899_s30  ;;  %333 = vst [vmem:[#allocation2] sm:$0xff] (!%p904_p12), %v1161_v4  ;;  %334 = vst [vmem:[#allocation2 + $0x8] sm:$0xff] (!%p904_p12), %v1161_v4 }
  0x28   : > { %s1266_s9 = scalar_lea.vmem %s1381_s3, %s899_s30  ;;  %s1271_s11 = scalar_lea.vmem %s1382_s4, %s899_s30  ;;  %335 = vst [vmem:[#allocation2 + $0x10] sm:$0xff] (!%p904_p12), %v1161_v4  ;;  %336 = vst [vmem:[#allocation2 + $0x18] sm:$0xff] (!%p904_p12), %v1161_v4 }
  0x29   : > { %332 = sbr.rel (%p904_p12) target bundleno = 48 (0x30), region = 78  ;;  %337 = vst [vmem:[#allocation2 + $0x20] sm:$0xff] (!%p904_p12), %v1161_v4  ;;  %338 = vst [vmem:[#allocation2 + $0x28] sm:$0xff] (!%p904_p12), %v1161_v4 }
  0x2a   : > { %339 = vst [vmem:[#allocation2 + $0x30] sm:$0xff] (!%p904_p12), %v1161_v4  ;;  %340 = vst [vmem:[#allocation2 + $0x38] sm:$0xff] (!%p904_p12), %v1161_v4 }
  0x2b   : > { %341 = vst [vmem:[#allocation2 + $0x40] sm:$0xff] (!%p904_p12), %v1161_v4  ;;  %342 = vst [vmem:[#allocation2 + $0x48] sm:$0xff] (!%p904_p12), %v1161_v4 }
  0x2c   : > { %343 = vst [vmem:[#allocation2 + $0x50] sm:$0xff] (!%p904_p12), %v1161_v4  ;;  %344 = vst [vmem:[#allocation2 + $0x58] sm:$0xff] (!%p904_p12), %v1161_v4 }
  0x2d   : > { %345 = vst [vmem:[#allocation2 + $0x60] sm:$0xff] (!%p904_p12), %v1161_v4  ;;  %346 = vst [vmem:[#allocation2 + $0x68] sm:$0xff] (!%p904_p12), %v1161_v4 }
  0x2e   : > { %347 = vst [vmem:[#allocation2 + $0x70] sm:$0xff] (!%p904_p12), %v1161_v4  ;;  %348 = vst [vmem:[#allocation2 + $0x78] sm:$0xff] (!%p904_p12), %v1161_v4 }
  0x30 PF: > { %v349_v5 = vld [vmem:[%s1256_s29] sm:$0xff]  ;;  %v350_v6 = vld [vmem:[%s1256_s29 + $0x8] sm:$0xff]  ;;  %v351_v7 = vld [vmem:[%s1256_s29 + $0x10] sm:$0xff]  ;;  %p905_p13 = scmp.ne.s32.totalorder %s1143_s17, 1 }
  0x31   : > { %v997_v8 = vpack.c.bf16 %v350_v6, %v349_v5  ;;  %v352_v9 = vld [vmem:[%s1256_s29 + $0x18] sm:$0xff]  ;;  %v353_v11 = vld [vmem:[%s1256_s29 + $0x20] sm:$0xff]  ;;  %v354_v12 = vld [vmem:[%s1256_s29 + $0x28] sm:$0xff] }
  0x32   : > { %v1001_v10 = vpack.c.bf16 %v352_v9, %v351_v7  ;;  %v1005_v13 = vpack.c.bf16 %v354_v12, %v353_v11  ;;  %v1283_v14 = vld [vmem:[%s1273_s12] sm:$0xff]  ;;  %v1286_v15 = vld [vmem:[%s1273_s12 + $0x10] sm:$0xff]  ;;  %v356_v17 = vld [vmem:[%s1256_s29 + $0x38] sm:$0xff] }
  0x33   : > { %998 = vmatprep.subr.bf16.mxu0 %v997_v8  ;;  %1029 = vmatprep.subr.bf16.mxu1 %v997_v8  ;;  %v355_v16 = vld [vmem:[%s1256_s29 + $0x30] sm:$0xff]  ;;  %v369_v18 = vunpack.c.0.s8 %v1283_v14  ;;  %v377_v19 = vunpack.c.0.s8 %v1286_v15  ;;  %v357_v23 = vld [vmem:[%s1256_s29 + $0x40] sm:$0xff]  ;;  %v358_v24 = vld [vmem:[%s1256_s29 + $0x48] sm:$0xff]  ;;  %v370_v35 = vunpack.c.1.s8 %v1283_v14  ;;  %v378_v36 = vunpack.c.1.s8 %v1286_v15 }
  0x34   : > { %1000 = vmatpush3.bf16.msra.mxu0 %v997_v8  ;;  %1037 = vmatpush3.bf16.msra.mxu1 %v997_v8  ;;  %v1009_v22 = vpack.c.bf16 %v356_v17, %v355_v16  ;;  %v1013_v25 = vpack.c.bf16 %v358_v24, %v357_v23  ;;  %v359_v26 = vld [vmem:[%s1256_s29 + $0x50] sm:$0xff]  ;;  %v360_v27 = vld [vmem:[%s1256_s29 + $0x58] sm:$0xff]  ;;  %v361_v29 = vld [vmem:[%s1256_s29 + $0x60] sm:$0xff]  ;;  %v371_v37 = vunpack.c.2.s8 %v1283_v14  ;;  %v379_v38 = vunpack.c.2.s8 %v1286_v15 }
  0x35   : > { %1002 = vmatprep.subr.bf16.mxu0 %v1001_v10  ;;  %1030 = vmatprep.subr.bf16.mxu1 %v1001_v10  ;;  %v385_v20 = vcvt.s32.f32 %v369_v18  ;;  %v393_v21 = vcvt.s32.f32 %v377_v19  ;;  %v1017_v28 = vpack.c.bf16 %v360_v27, %v359_v26  ;;  %v362_v30 = vld [vmem:[%s1256_s29 + $0x68] sm:$0xff]  ;;  %v363_v32 = vld [vmem:[%s1256_s29 + $0x70] sm:$0xff]  ;;  %v364_v33 = vld [vmem:[%s1256_s29 + $0x78] sm:$0xff]  ;;  %v386_v41 = vcvt.s32.f32 %v370_v35 }
  0x36   : > { %v1021_v31 = vpack.c.bf16 %v362_v30, %v361_v29  ;;  %v1025_v34 = vpack.c.bf16 %v364_v33, %v363_v32  ;;  %v366_v39 = vld [vmem:[%s1273_s12 + $0x8] sm:$0xff]  ;;  %v368_v40 = vld [vmem:[%s1273_s12 + $0x18] sm:$0xff]  ;;  %v394_v42 = vcvt.s32.f32 %v378_v36  ;;  %v372_v43 = vunpack.c.3.s8 %v1283_v14  ;;  %v401_v3 = vld [vmem:[#allocation2] sm:$0xff] }
  0x37   : > { %973 = vmatprep.mubr.f32.mxu0 %v385_v20  ;;  %985 = vmatprep.mubr.f32.mxu1 %v393_v21  ;;  %v380_v44 = vunpack.c.3.s8 %v1286_v15  ;;  %v387_v45 = vcvt.s32.f32 %v371_v37  ;;  %v395_v46 = vcvt.s32.f32 %v379_v38  ;;  %v373_v47 = vunpack.c.0.s8 %v366_v39  ;;  %v402_v1 = vld [vmem:[#allocation2 + $0x8] sm:$0xff]  ;;  %v409_v4 = vld [vmem:[#allocation2 + $0x40] sm:$0xff]  ;;  %v412_v14 = vld [vmem:[#allocation2 + $0x58] sm:$0xff] }
  0x38   : > { %1004 = vmatpush3.bf16.msra.mxu0 %v1001_v10  ;;  %1038 = vmatpush3.bf16.msra.mxu1 %v1001_v10  ;;  %v381_v48 = vunpack.c.0.s8 %v368_v40  ;;  %v388_v49 = vcvt.s32.f32 %v372_v43  ;;  %v374_v51 = vunpack.c.1.s8 %v366_v39  ;;  %v382_v52 = vunpack.c.1.s8 %v368_v40  ;;  %v410_v2 = vld [vmem:[#allocation2 + $0x48] sm:$0xff]  ;;  %v403_v15 = vld [vmem:[#allocation2 + $0x10] sm:$0xff]  ;;  %v405_v27 = vld [vmem:[#allocation2 + $0x20] sm:$0xff] }
  0x39   : > { %1006 = vmatprep.subr.bf16.mxu0 %v1005_v13  ;;  %1031 = vmatprep.subr.bf16.mxu1 %v1005_v13  ;;  %v396_v50 = vcvt.s32.f32 %v380_v44  ;;  %v389_v53 = vcvt.s32.f32 %v373_v47  ;;  %v375_v55 = vunpack.c.2.s8 %v366_v39  ;;  %v383_v56 = vunpack.c.2.s8 %v368_v40  ;;  %v411_v16 = vld [vmem:[#allocation2 + $0x50] sm:$0xff]  ;;  %v414_v26 = vld [vmem:[#allocation2 + $0x68] sm:$0xff]  ;;  %v408_v37 = vld [vmem:[#allocation2 + $0x38] sm:$0xff] }
  0x3a   : > { %v397_v54 = vcvt.s32.f32 %v381_v48  ;;  %v390_v57 = vcvt.s32.f32 %v374_v51  ;;  %v398_v58 = vcvt.s32.f32 %v382_v52  ;;  %v376_v59 = vunpack.c.3.s8 %v366_v39  ;;  %v416_v38 = vld [vmem:[#allocation2 + $0x78] sm:$0xff]  ;;  %v407_v39 = vld [vmem:[#allocation2 + $0x30] sm:$0xff] }
  0x3b   : > { %v384_v60 = vunpack.c.3.s8 %v368_v40  ;;  %v391_v61 = vcvt.s32.f32 %v375_v55  ;;  %v399_v62 = vcvt.s32.f32 %v383_v56  ;;  %v415_v40 = vld [vmem:[#allocation2 + $0x70] sm:$0xff]  ;;  %v1162_v51 = vmov (!%p905_p13), 0   ;;  %v617_v52 = vld [vmem:[%s1266_s9 + $0x18] sm:$0xff] (!%p905_p13)  ;;  %v618_v55 = vld [vmem:[%s1266_s9 + $0x20] sm:$0xff] (!%p905_p13) }
  0x3c   : > { %1008 = vmatpush3.bf16.msra.mxu0 %v1005_v13  ;;  %1039 = vmatpush3.bf16.msra.mxu1 %v1005_v13  ;;  %v392_v63 = vcvt.s32.f32 %v376_v59  ;;  %v404_v13 = vld [vmem:[#allocation2 + $0x18] sm:$0xff]  ;;  %v622_v59 = vld [vmem:[%s1266_s9 + $0x40] sm:$0xff] (!%p905_p13) }
  0x3d   : > { %1010 = vmatprep.subr.bf16.mxu0 %v1009_v22  ;;  %1032 = vmatprep.subr.bf16.mxu1 %v1009_v22  ;;  %v400_v0 = vcvt.s32.f32 %v384_v60  ;;  %v621_v56 = vld [vmem:[%s1266_s9 + $0x38] sm:$0xff] (!%p905_p13) }
  0x3e   : > { %1104 = vset.pattern.permute.xlu1 (!%p905_p13), %v1162_v51  ;;  %1103 = vset.pattern.permute.xlu0 (!%p905_p13), %v1162_v51  ;;  %v625_v60 = vld [vmem:[%s1266_s9 + $0x58] sm:$0xff] (!%p905_p13) }
  0x40   : > { %1012 = vmatpush3.bf16.msra.mxu0 %v1009_v22  ;;  %1040 = vmatpush3.bf16.msra.mxu1 %v1009_v22 }
  0x41   : > { %1014 = vmatprep.subr.bf16.mxu0 %v1013_v25  ;;  %1033 = vmatprep.subr.bf16.mxu1 %v1013_v25 }
  0x44   : > { %1016 = vmatpush3.bf16.msra.mxu0 %v1013_v25  ;;  %1041 = vmatpush3.bf16.msra.mxu1 %v1013_v25  ;;  %v406_v25 = vld [vmem:[#allocation2 + $0x28] sm:$0xff] }
  0x45   : > { %1018 = vmatprep.subr.bf16.mxu0 %v1017_v28  ;;  %1034 = vmatprep.subr.bf16.mxu1 %v1017_v28 }
  0x48   : > { %1020 = vmatpush3.bf16.msra.mxu0 %v1017_v28  ;;  %1042 = vmatpush3.bf16.msra.mxu1 %v1017_v28  ;;  %v413_v28 = vld [vmem:[#allocation2 + $0x60] sm:$0xff] }
  0x49   : > { %1022 = vmatprep.subr.bf16.mxu0 %v1021_v31  ;;  %1035 = vmatprep.subr.bf16.mxu1 %v1021_v31 }
  0x4c   : > { %1024 = vmatpush3.bf16.msra.mxu0 %v1021_v31  ;;  %1043 = vmatpush3.bf16.msra.mxu1 %v1021_v31 }
  0x4d   : > { %1026 = vmatprep.subr.bf16.mxu0 %v1025_v34  ;;  %1036 = vmatprep.subr.bf16.mxu1 %v1025_v34 }
  0x50   : > { %1028 = vmatpush3.bf16.msra.mxu0 %v1025_v34  ;;  %1044 = vmatpush3.bf16.msra.mxu1 %v1025_v34 }
  0x53   : > { %974 = vmatmul.mubr.f32.vlgmr.msra.gmra.mrb[0].mxu0 %v386_v41  ;;  %986 = vmatmul.mubr.f32.vlgmr.msra.gmra.mrb[0].mxu1 %v394_v42 }
  0x54   : > { %976 = vmatprep.mubr.f32.mxu0 %v387_v45  ;;  %988 = vmatprep.mubr.f32.mxu1 %v395_v46 }
  0x57   : > { %977 = vmatmul.mubr.f32.gmra.mrb[2].mxu0 %v388_v49  ;;  %989 = vmatmul.mubr.f32.gmra.mrb[2].mxu1 %v396_v50  ;;  %v616_v49 = vld [vmem:[%s1266_s9 + $0x10] sm:$0xff] (!%p905_p13)  ;;  %v614_v50 = vld [vmem:[%s1266_s9] sm:$0xff] (!%p905_p13) }
  0x58   : > { %979 = vmatprep.mubr.f32.mxu0 %v389_v53  ;;  %991 = vmatprep.mubr.f32.mxu1 %v397_v54  ;;  %v615_v53 = vld [vmem:[%s1266_s9 + $0x8] sm:$0xff] (!%p905_p13) }
  0x59   : > { %642 = vperm.xlu1 (!%p905_p13), %1104, %v616_v49   ;;  %632 = vperm.xlu0 (!%p905_p13), %1103, %v614_v50   ;;  %v619_v54 = vld [vmem:[%s1266_s9 + $0x28] sm:$0xff] (!%p905_p13) }
  0x5b   : > { %980 = vmatmul.mubr.f32.gmra.mrb[4].mxu0 %v390_v57  ;;  %992 = vmatmul.mubr.f32.gmra.mrb[4].mxu1 %v398_v58  ;;  %v620_v57 = vld [vmem:[%s1266_s9 + $0x30] sm:$0xff] (!%p905_p13)  ;;  %v623_v58 = vld [vmem:[%s1266_s9 + $0x48] sm:$0xff] (!%p905_p13) }
  0x5c   : > { %982 = vmatprep.mubr.f32.mxu0 %v391_v61  ;;  %994 = vmatprep.mubr.f32.mxu1 %v399_v62  ;;  %v624_v61 = vld [vmem:[%s1266_s9 + $0x50] sm:$0xff] (!%p905_p13)  ;;  %v627_v62 = vld [vmem:[%s1266_s9 + $0x68] sm:$0xff] (!%p905_p13) }
  0x5d   : > { %647 = vperm.xlu1 (!%p905_p13), %1104, %v617_v52   ;;  %637 = vperm.xlu0 (!%p905_p13), %1103, %v615_v53  }
  0x5f   : > { %983 = vmatmul.mubr.f32.gmra.mrb[6].mxu0 %v392_v63  ;;  %995 = vmatmul.mubr.f32.gmra.mrb[6].mxu1 %v400_v0  ;;  %v626_v63 = vld [vmem:[%s1266_s9 + $0x60] sm:$0xff] (!%p905_p13)  ;;  %v629_v0 = vld [vmem:[%s1266_s9 + $0x78] sm:$0xff] (!%p905_p13) }
  0x61   : > { %657 = vperm.xlu1 (!%p905_p13), %1104, %v619_v54   ;;  %652 = vperm.xlu0 (!%p905_p13), %1103, %v618_v55   ;;  %v737_v54 = vld [vmem:[%s1261_s7 + $0x58] sm:$0xff] (!%p905_p13) }
  0x65   : > { %667 = vperm.xlu1 (!%p905_p13), %1104, %v621_v56   ;;  %662 = vperm.xlu0 (!%p905_p13), %1103, %v620_v57   ;;  %v736_v56 = vld [vmem:[%s1261_s7 + $0x50] sm:$0xff] (!%p905_p13) }
  0x69   : > { %677 = vperm.xlu1 (!%p905_p13), %1104, %v623_v58   ;;  %672 = vperm.xlu0 (!%p905_p13), %1103, %v622_v59  }
  0x6d   : > { %687 = vperm.xlu1 (!%p905_p13), %1104, %v625_v60   ;;  %682 = vperm.xlu0 (!%p905_p13), %1103, %v624_v61  }
  0x71   : > { %697 = vperm.xlu1 (!%p905_p13), %1104, %v627_v62   ;;  %692 = vperm.xlu0 (!%p905_p13), %1103, %v626_v63  }
  0x75   : > { %707 = vperm.xlu1 (!%p905_p13), %1104, %v629_v0   ;;  %v739_v0 = vld [vmem:[%s1261_s7 + $0x68] sm:$0xff] (!%p905_p13) }
 0x126   : > { %v975_v5 = vpop.f32.mrb[0].mxu0  ;;  %v987_v6 = vpop.f32.mrb[0].mxu1 }
 0x127   : > { %v563_v7 = vadd.f32 %v975_v5, %v402_v1  ;;  %v571_v8 = vadd.f32 %v987_v6, %v410_v2  ;;  %v483_v9 = vpop.f32.mrb[1].mxu0  ;;  %v523_v10 = vpop.f32.mrb[1].mxu1  ;;  %v628_v1 = vld [vmem:[%s1266_s9 + $0x70] sm:$0xff] (!%p905_p13)  ;;  %v726_v6 = vld [vmem:[%s1261_s7] sm:$0xff] (!%p905_p13) }
 0x128   : > { %v562_v11 = vadd.f32 %v483_v9, %v401_v3  ;;  %v570_v12 = vadd.f32 %v523_v10, %v409_v4  ;;  %702 = vperm.xlu0 (!%p905_p13), %1103, %v628_v1   ;;  %v728_v4 = vld [vmem:[%s1261_s7 + $0x10] sm:$0xff] (!%p905_p13)  ;;  %v643_v5 = vpop.permute.xlu1 (!%p905_p13), %642 }
 0x129   : > { %579 = vst [vmem:[#allocation2 + $0x8] sm:$0xff] %v563_v7  ;;  %587 = vst [vmem:[#allocation2 + $0x48] sm:$0xff] %v571_v8  ;;  %v633_v7 = vpop.permute.xlu0 (!%p905_p13), %632 }
 0x12a   : > { %578 = vst [vmem:[#allocation2] sm:$0xff] %v562_v11  ;;  %586 = vst [vmem:[#allocation2 + $0x40] sm:$0xff] %v570_v12  ;;  %v978_v17 = vpop.f32.mrb[2].mxu0  ;;  %v990_v18 = vpop.f32.mrb[2].mxu1 }
 0x12b   : > { %v565_v19 = vadd.f32 %v978_v17, %v404_v13  ;;  %v573_v20 = vadd.f32 %v990_v18, %v412_v14  ;;  %v493_v21 = vpop.f32.mrb[3].mxu0  ;;  %v533_v22 = vpop.f32.mrb[3].mxu1  ;;  %v729_v14 = vld [vmem:[%s1261_s7 + $0x18] sm:$0xff] (!%p905_p13) }
 0x12c   : > { %v564_v23 = vadd.f32 %v493_v21, %v403_v15  ;;  %v572_v24 = vadd.f32 %v533_v22, %v411_v16  ;;  %v648_v15 = vpop.permute.xlu1 (!%p905_p13), %647  ;;  %v727_v16 = vld [vmem:[%s1261_s7 + $0x8] sm:$0xff] (!%p905_p13) }
 0x12d   : > { %581 = vst [vmem:[#allocation2 + $0x18] sm:$0xff] %v565_v19  ;;  %589 = vst [vmem:[#allocation2 + $0x58] sm:$0xff] %v573_v20  ;;  %v638_v17 = vpop.permute.xlu0 (!%p905_p13), %637 }
 0x12e   : > { %580 = vst [vmem:[#allocation2 + $0x10] sm:$0xff] %v564_v23  ;;  %588 = vst [vmem:[#allocation2 + $0x50] sm:$0xff] %v572_v24  ;;  %v981_v29 = vpop.f32.mrb[4].mxu0  ;;  %v993_v30 = vpop.f32.mrb[4].mxu1  ;;  %v731_v24 = vld [vmem:[%s1261_s7 + $0x28] sm:$0xff] (!%p905_p13) }
 0x12f   : > { %v567_v31 = vadd.f32 %v981_v29, %v406_v25  ;;  %v575_v32 = vadd.f32 %v993_v30, %v414_v26  ;;  %v503_v33 = vpop.f32.mrb[5].mxu0  ;;  %v543_v34 = vpop.f32.mrb[5].mxu1  ;;  %v730_v26 = vld [vmem:[%s1261_s7 + $0x20] sm:$0xff] (!%p905_p13) }
 0x130   : > { %v566_v35 = vadd.f32 %v503_v33, %v405_v27  ;;  %v574_v36 = vadd.f32 %v543_v34, %v413_v28  ;;  %597 = sbr.rel (%p905_p13) target bundleno = 429 (0x1ad), region = 82  ;;  %v599_v11 = vld [vmem:[#allocation2 + $0x8] sm:$0xff] (!%p905_p13)  ;;  %v658_v25 = vpop.permute.xlu1 (!%p905_p13), %657  ;;  %v733_v34 = vld [vmem:[%s1261_s7 + $0x38] sm:$0xff] (!%p905_p13) }
 0x131   : > { %583 = vst [vmem:[#allocation2 + $0x28] sm:$0xff] %v567_v31  ;;  %591 = vst [vmem:[#allocation2 + $0x68] sm:$0xff] %v575_v32  ;;  %v598_v3 = vld [vmem:[#allocation2] sm:$0xff] (!%p905_p13)  ;;  %v711_v19 = vmul.f32 (!%p905_p13), %v638_v17, %v599_v11  ;;  %v653_v27 = vpop.permute.xlu0 (!%p905_p13), %652 }
 0x132   : > { %582 = vst [vmem:[#allocation2 + $0x20] sm:$0xff] %v566_v35  ;;  %590 = vst [vmem:[#allocation2 + $0x60] sm:$0xff] %v574_v36  ;;  %v984_v41 = vpop.f32.mrb[6].mxu0  ;;  %v996_v42 = vpop.f32.mrb[6].mxu1  ;;  %v710_v9 = vmul.f32 (!%p905_p13), %v633_v7, %v598_v3  ;;  %v732_v36 = vld [vmem:[%s1261_s7 + $0x30] sm:$0xff] (!%p905_p13) }
 0x133   : > { %v569_v43 = vadd.f32 %v984_v41, %v408_v37  ;;  %v577_v44 = vadd.f32 %v996_v42, %v416_v38  ;;  %v513_v45 = vpop.f32.mrb[7].mxu0  ;;  %v553_v46 = vpop.f32.mrb[7].mxu1  ;;  %v743_v23 = vadd.f32 (!%p905_p13), %v727_v16, %v711_v19  ;;  %v606_v41 = vld [vmem:[#allocation2 + $0x40] sm:$0xff] (!%p905_p13) }
 0x134   : > { %v568_v47 = vadd.f32 %v513_v45, %v407_v39  ;;  %v576_v48 = vadd.f32 %v553_v46, %v415_v40  ;;  %v601_v10 = vld [vmem:[#allocation2 + $0x18] sm:$0xff] (!%p905_p13)  ;;  %v742_v13 = vadd.f32 (!%p905_p13), %v726_v6, %v710_v9  ;;  %v668_v35 = vpop.permute.xlu1 (!%p905_p13), %667  ;;  %v607_v40 = vld [vmem:[#allocation2 + $0x48] sm:$0xff] (!%p905_p13)  ;;  %v734_v46 = vld [vmem:[%s1261_s7 + $0x40] sm:$0xff] (!%p905_p13) }
 0x135   : > { %585 = vst [vmem:[#allocation2 + $0x38] sm:$0xff] %v569_v43  ;;  %593 = vst [vmem:[#allocation2 + $0x78] sm:$0xff] %v577_v44  ;;  %v600_v2 = vld [vmem:[#allocation2 + $0x10] sm:$0xff] (!%p905_p13)  ;;  %v713_v18 = vmul.f32 (!%p905_p13), %v648_v15, %v601_v10  ;;  %v663_v37 = vpop.permute.xlu0 (!%p905_p13), %662  ;;  %v735_v44 = vld [vmem:[%s1261_s7 + $0x48] sm:$0xff] (!%p905_p13) }
 0x136   : > { %584 = vst [vmem:[#allocation2 + $0x30] sm:$0xff] %v568_v47  ;;  %592 = vst [vmem:[#allocation2 + $0x70] sm:$0xff] %v576_v48  ;;  %v712_v8 = vmul.f32 (!%p905_p13), %v643_v5, %v600_v2  ;;  %v609_v50 = vld [vmem:[#allocation2 + $0x58] sm:$0xff] (!%p905_p13)  ;;  %v608_v51 = vld [vmem:[#allocation2 + $0x50] sm:$0xff] (!%p905_p13) }
 0x137   : > { %758 = vst [vmem:[%s1271_s11] sm:$0xff] %v742_v13  ;;  %v745_v22 = vadd.f32 %v729_v14, %v713_v18  ;;  %759 = vst [vmem:[%s1271_s11 + $0x8] sm:$0xff] %v743_v23  ;;  %v738_v2 = vld [vmem:[%s1261_s7 + $0x60] sm:$0xff]  ;;  %v741_v10 = vld [vmem:[%s1261_s7 + $0x78] sm:$0xff] }
 0x138   : > { %v744_v12 = vadd.f32 %v728_v4, %v712_v8  ;;  %v603_v20 = vld [vmem:[#allocation2 + $0x28] sm:$0xff]  ;;  %v678_v45 = vpop.permute.xlu1 %677 }
 0x139   : > { %v602_v21 = vld [vmem:[#allocation2 + $0x20] sm:$0xff]  ;;  %761 = vst [vmem:[%s1271_s11 + $0x18] sm:$0xff] %v745_v22  ;;  %v715_v28 = vmul.f32 %v658_v25, %v603_v20  ;;  %v673_v47 = vpop.permute.xlu0 %672  ;;  %v719_v48 = vmul.f32 %v678_v45, %v607_v40  ;;  %v611_v60 = vld [vmem:[#allocation2 + $0x68] sm:$0xff] }
 0x13a   : > { %760 = vst [vmem:[%s1271_s11 + $0x10] sm:$0xff] %v744_v12  ;;  %v714_v29 = vmul.f32 %v653_v27, %v602_v21  ;;  %v718_v49 = vmul.f32 %v673_v47, %v606_v41  ;;  %v610_v61 = vld [vmem:[#allocation2 + $0x60] sm:$0xff]  ;;  %v740_v12 = vld [vmem:[%s1261_s7 + $0x70] sm:$0xff] }
 0x13b   : > { %v747_v32 = vadd.f32 %v731_v24, %v715_v28  ;;  %v751_v52 = vadd.f32 %v735_v44, %v719_v48 }
 0x13c   : > { %v605_v30 = vld [vmem:[#allocation2 + $0x38] sm:$0xff]  ;;  %v746_v33 = vadd.f32 %v730_v26, %v714_v29  ;;  %v750_v53 = vadd.f32 %v734_v46, %v718_v49  ;;  %v688_v55 = vpop.permute.xlu1 %687 }
 0x13d   : > { %v604_v31 = vld [vmem:[#allocation2 + $0x30] sm:$0xff]  ;;  %763 = vst [vmem:[%s1271_s11 + $0x28] sm:$0xff] %v747_v32  ;;  %v717_v38 = vmul.f32 %v668_v35, %v605_v30  ;;  %v683_v57 = vpop.permute.xlu0 %682  ;;  %767 = vst [vmem:[%s1271_s11 + $0x48] sm:$0xff] %v751_v52  ;;  %v721_v58 = vmul.f32 %v688_v55, %v609_v50  ;;  %v613_v6 = vld [vmem:[#allocation2 + $0x78] sm:$0xff] }
 0x13e   : > { %762 = vst [vmem:[%s1271_s11 + $0x20] sm:$0xff] %v746_v33  ;;  %v716_v39 = vmul.f32 %v663_v37, %v604_v31  ;;  %766 = vst [vmem:[%s1271_s11 + $0x40] sm:$0xff] %v750_v53  ;;  %v720_v59 = vmul.f32 %v683_v57, %v608_v51  ;;  %v612_v7 = vld [vmem:[#allocation2 + $0x70] sm:$0xff] }
 0x13f   : > { %v749_v42 = vadd.f32 %v733_v34, %v717_v38  ;;  %v753_v62 = vadd.f32 %v737_v54, %v721_v58 }
 0x140   : > { %v748_v43 = vadd.f32 %v732_v36, %v716_v39  ;;  %v752_v63 = vadd.f32 %v736_v56, %v720_v59  ;;  %v698_v1 = vpop.permute.xlu1 %697 }
 0x141   : > { %765 = vst [vmem:[%s1271_s11 + $0x38] sm:$0xff] %v749_v42  ;;  %v693_v3 = vpop.permute.xlu0 %692  ;;  %769 = vst [vmem:[%s1271_s11 + $0x58] sm:$0xff] %v753_v62  ;;  %v723_v4 = vmul.f32 %v698_v1, %v611_v60 }
 0x142   : > { %764 = vst [vmem:[%s1271_s11 + $0x30] sm:$0xff] %v748_v43  ;;  %768 = vst [vmem:[%s1271_s11 + $0x50] sm:$0xff] %v752_v63  ;;  %v722_v5 = vmul.f32 %v693_v3, %v610_v61 }
 0x143   : > { %v755_v8 = vadd.f32 %v739_v0, %v723_v4 }
 0x144   : > { %v754_v9 = vadd.f32 %v738_v2, %v722_v5  ;;  %v708_v11 = vpop.permute.xlu1 %707 }
 0x145   : > { %771 = vst [vmem:[%s1271_s11 + $0x68] sm:$0xff] %v755_v8  ;;  %v725_v14 = vmul.f32 %v708_v11, %v613_v6 }
 0x146   : > { %770 = vst [vmem:[%s1271_s11 + $0x60] sm:$0xff] %v754_v9 }
 0x147   : > { %v757_v16 = vadd.f32 %v741_v10, %v725_v14 }
 0x149   : > { %773 = vst [vmem:[%s1271_s11 + $0x78] sm:$0xff] %v757_v16 }
 0x1a7   : > { %v703_v13 = vpop.permute.xlu0 %702 }
 0x1a8   : > { %v724_v15 = vmul.f32 %v703_v13, %v612_v7 }
 0x1aa   : > { %v756_v17 = vadd.f32 %v740_v12, %v724_v15 }
 0x1ac   : > { %772 = vst [vmem:[%s1271_s11 + $0x70] sm:$0xff] %v756_v17 }
 0x1ad PF: > { %s14_s21 = sadd.s32 1, %s1159_s21   ;;  %s1383_s15 = smov %s1139_s16 }
 0x1ae   : > { %p11_p0 = scmp.ge.s32.totalorder %s14_s21, 6   ;;  %s1384_s16 = smov %s1239_s28 }
 0x1af   : > { %s1385_s17 = smov %s1151_s19  ;;  %s1386_s18 = smov %s1155_s20 }
 0x1b0   : > { %s1387_s19 = smov %s1390_s22  ;;  %s1388_s20 = smov %s1394_s23 }
 0x1b1   :  { %13 = sbr.rel (!%p11_p0) target bundleno = 4 (0x4), region = 126 }

</bundles_post_ra>
